<compile_context>
chip_gen: v5e
topology: v5e:2x2
jax: 0.10.0
libtpu: 0.0.40
codegen_flags: <defaults>
</compile_context>

<pallas_src>
import functools
import math

import jax
import jax.numpy as jnp
from jax.experimental import pallas as pl
from jax.experimental.pallas import tpu as pltpu

_LANES = 128
_TARGET_TILE_BYTES = 4 * 1024 * 1024      # per x (and per out) tile
_MAX_TM = 8192                            # bounds the lane-padded t-block waste
_VMEM_BUDGET = 32 * 1024 * 1024           # double-buffered working set target
_VMEM_LIMIT_CAP = 48 * 1024 * 1024        # safe on v7x (64 MiB physical VMEM)


def _tie_kernel(w_ref, p_ref, x_ref, t_ref, o_ref, *, use_matmul: bool):
    """out = x + sin(t * div + phase); add in f32, single cast to out dtype."""
    t = t_ref[...]                       # (tm, t_cols) f32
    w = w_ref[...]                       # (w_rows, L)  f32 (div table)
    if use_matmul:
        # Lane-repacked path: broadcast each packed row's time value to its
        # D-lane group and scale by div with one small matmul.  HIGHEST keeps
        # the f32 operands at f32 accuracy on the (otherwise idle) MXU.
        base = jnp.dot(t, w,
                       precision=jax.lax.Precision.HIGHEST,
                       preferred_element_type=jnp.float32)          # (tm, L)
    else:
        base = t * w                     # (tm, 1) * (1, L) broadcast -> (tm, L)
    enc = jnp.sin(base + p_ref[...])     # single phase-shifted sin (no cos/where)
    o_ref[...] = (x_ref[...].astype(jnp.float32) + enc).astype(o_ref.dtype)


def _pack_factor(D: int, N: int) -> int:
    """Rows packed per lane-dense output row (1 if D is already a 128-multiple)."""
    if D % _LANES == 0:
        return 1
    k = math.lcm(D, _LANES) // D
    if k <= 64 and N % k == 0:
        return k
    return 1        # fall back to masked stores for awkward shapes


def time_interval_encoding(x: jax.Array, time_intervals: jax.Array) -> jax.Array:
    """x: [B, S, D]; time_intervals: [B, S]. Returns x + sinusoidal(time) (eval mode)."""
    B, S, D = x.shape
    assert D % 2 == 0, "d_model must be even (same constraint as the PyTorch module)"
    N = B * S
    itemsize = jnp.dtype(x.dtype).itemsize
    sub = 8 if itemsize >= 4 else (16 if itemsize == 2 else 32)   # min sublane tile

    # ---- per-lane constant tables (hoisted out of the kernel) -------------
    half = jnp.exp(jnp.arange(0, D, 2, dtype=jnp.float32) * (-math.log(10000.0) / D))
    div_full = jnp.repeat(half, 2)                                            # (D,)
    phase_full = jnp.tile(jnp.array([0.0, math.pi / 2.0], jnp.float32), D // 2)  # (D,)

    # ---- lane-dense repacking (D < 128, or D >= 128 not a 128-multiple) ----
    k = _pack_factor(D, N)
    L = k * D
    R = N // k

    x2 = x.reshape(R, L)
    t_flat = time_intervals.reshape(N).astype(jnp.float32)

    if k == 1:
        w = div_full.reshape(1, D)
        phase = phase_full.reshape(1, D)
        t2 = t_flat.reshape(R, 1)
        t_cols = 1
        use_matmul = False
    else:
        k_pad = ((k + 7) // 8) * 8                    # sublane-align the matmul K dim
        w = jnp.zeros((k_pad, L), jnp.float32)
        for g in range(k):
            w = w.at[g, g * D:(g + 1) * D].set(div_full)
        phase = jnp.tile(phase_full, k).reshape(1, L)
        t2 = t_flat.reshape(R, k)
        if k_pad != k:
            t2 = jnp.pad(t2, ((0, 0), (0, k_pad - k)))
        t_cols = k_pad
        use_matmul = True

    # ---- pad rows so every block respects the (sub, 128) min-tile rule -----
    R_pad = ((R + sub - 1) // sub) * sub
    if R_pad != R:
        x2 = jnp.pad(x2, ((0, R_pad - R), (0, 0)))
        t2 = jnp.pad(t2, ((0, R_pad - R), (0, 0)))

    # ---- row-tile size: bytes-bounded + double-buffered VMEM budget --------
    bytes_per_row = L * itemsize
    t_row_padded = _LANES * 4            # (tm, t_cols) block lane-pads to 128 lanes
    tm_by_tile = _TARGET_TILE_BYTES // max(bytes_per_row, 1)
    tm_by_budget = _VMEM_BUDGET // (2 * (2 * bytes_per_row + t_row_padded))
    tm = int(max(sub, min(_MAX_TM, tm_by_tile, tm_by_budget)))
    tm = (tm // sub) * sub
    if tm >= R_pad:
        tm = R_pad
    grid = (pl.cdiv(R_pad, tm),)

    # ---- scoped-VMEM limit = real footprint (incl. lane-padded t), capped ---
    x_tile = tm * L * itemsize
    t_tile = tm * t_row_padded
    w_sub = ((w.shape[0] + 7) // 8) * 8
    const_bytes = (w_sub + 8) * L * 4
    working = 2 * (2 * x_tile + t_tile) + const_bytes
    vmem_limit = int(min(_VMEM_LIMIT_CAP, max(16 * 2**20, working + 2 * 2**20)))

    n_elems = R_pad * L
    cost = pl.CostEstimate(
        flops=6 * n_elems + (2 * n_elems * t_cols if use_matmul else 0),
        transcendentals=n_elems,
        bytes_accessed=2 * n_elems * itemsize + R_pad * t_cols * 4 + const_bytes,
    )

    kernel = functools.partial(_tie_kernel, use_matmul=use_matmul)
    w_rows = w.shape[0]

    out2 = pl.pallas_call(
        kernel,
        out_shape=jax.ShapeDtypeStruct((R_pad, L), x.dtype),
        grid_spec=pltpu.PrefetchScalarGridSpec(
            num_scalar_prefetch=0,
            grid=grid,
            in_specs=[
                pl.BlockSpec((w_rows, L), lambda i: (0, 0)),     # div table (resident)
                pl.BlockSpec((1, L), lambda i: (0, 0)),          # phase table (resident)
                pl.BlockSpec((tm, L), lambda i: (i, 0)),         # x rows
                pl.BlockSpec((tm, t_cols), lambda i: (i, 0)),    # time rows
            ],
            out_specs=pl.BlockSpec((tm, L), lambda i: (i, 0)),
        ),
        compiler_params=pltpu.CompilerParams(
            dimension_semantics=("parallel",),
            vmem_limit_bytes=vmem_limit,
        ),
        cost_estimate=cost,
    )(w, phase, x2, t2)

    if R_pad != R:
        out2 = out2[:R]
    # TODO(synk): training-mode dropout not implemented (kernel == eval mode).
    return out2.reshape(B, S, D)


def _reference(x, time_intervals):
    """Pure-JAX mirror of the PyTorch module (eval mode)."""
    B, S, D = x.shape
    div_term = jnp.exp(jnp.arange(0, D, 2, dtype=jnp.float32)
                       * (-math.log(10000.0) / D))
    t = time_intervals[:, :, None].astype(jnp.float32)
    enc = jnp.zeros((B, S, D), jnp.float32)
    enc = enc.at[:, :, 0::2].set(jnp.sin(t * div_term))
    enc = enc.at[:, :, 1::2].set(jnp.cos(t * div_term))
    return (x.astype(jnp.float32) + enc).astype(x.dtype)


if __name__ == "__main__":
    def _check(B, S, D, dtype, atol, rtol, key):
        kx, kt = jax.random.split(key)
        x = jax.random.normal(kx, (B, S, D), dtype=jnp.float32).astype(dtype)
        t = jax.random.uniform(kt, (B, S), dtype=jnp.float32,
                               minval=0.0, maxval=100.0)
        out = jax.block_until_ready(time_interval_encoding(x, t))
        ref = _reference(x, t)
        assert out.shape == (B, S, D) and out.dtype == x.dtype
        ok = jnp.allclose(out.astype(jnp.float32), ref.astype(jnp.float32),
                          atol=atol, rtol=rtol)
        assert bool(ok), f"mismatch vs reference for shape {(B, S, D)} {dtype}"

    key = jax.random.PRNGKey(0)
    k1, k2, k3 = jax.random.split(key, 3)
    # Module-consistent small shape (batch=2, seq=8, d_model=32): lane-repacked
    # (matmul) path; tolerance covers the multi-pass f32 MXU contraction.
    _check(2, 8, 32, jnp.float32, 1e-3, 1e-3, k1)
    # d_model >= 128: the production-typical, already lane-dense broadcast path.
    _check(2, 8, 128, jnp.float32, 1e-4, 1e-4, k2)
    # bf16 input: f32 add + single cast to bf16 output.
    _check(2, 8, 128, jnp.bfloat16, 5e-2, 5e-2, k3)
    print("KERNEL_OK")
</pallas_src>

<mosaic_0001>
module attributes {stable_mosaic.version = 11 : i64} {
  func.func @_tie_kernel(%arg0: i32, %arg1: memref<8x128xf32, #tpu.memory_space<vmem>>, %arg2: memref<1x128xf32, #tpu.memory_space<vmem>>, %arg3: memref<8x128xf32, #tpu.memory_space<vmem>>, %arg4: memref<8x8xf32, #tpu.memory_space<vmem>>, %arg5: memref<8x128xf32, #tpu.memory_space<vmem>>) attributes {dimension_semantics = [#tpu.dimension_semantics<parallel>], iteration_bounds = array<i64: 1>, scalar_prefetch = 0 : i64, scratch_operands = 0 : i64, tpu.core_type = #tpu.core_type<tc>, window_params = [{pipeline_mode = #tpu.pipeline_mode<synchronous>, transform_indices = @transform_0, window_bounds = array<i64: 8, 128>}, {pipeline_mode = #tpu.pipeline_mode<synchronous>, transform_indices = @transform_1, window_bounds = array<i64: 1, 128>}, {transform_indices = @transform_2, window_bounds = array<i64: 8, 128>}, {transform_indices = @transform_3, window_bounds = array<i64: 8, 8>}, {transform_indices = @transform_4, window_bounds = array<i64: 8, 128>}]} {
    %c0 = arith.constant 0 : index
    %c0_0 = arith.constant 0 : index
    %0 = vector.load %arg4[%c0, %c0_0] : memref<8x8xf32, #tpu.memory_space<vmem>>, vector<8x8xf32>
    %c0_1 = arith.constant 0 : index
    %c0_2 = arith.constant 0 : index
    %1 = vector.load %arg1[%c0_1, %c0_2] : memref<8x128xf32, #tpu.memory_space<vmem>>, vector<8x128xf32>
    %cst = arith.constant dense<0.000000e+00> : vector<8x128xf32>
    %2 = tpu.matmul %0, %1, %cst {dimension_numbers = #tpu.dot_dimension_numbers<[1], [0], [0], [1], [0, 0, 1, 1], [], []>, precision = #tpu.contract_precision<fp32>} : vector<8x8xf32>, vector<8x128xf32>, vector<8x128xf32> -> vector<8x128xf32>
    %c0_3 = arith.constant 0 : index
    %c0_4 = arith.constant 0 : index
    %3 = vector.load %arg2[%c0_3, %c0_4] : memref<1x128xf32, #tpu.memory_space<vmem>>, vector<1x128xf32>
    %4 = vector.broadcast %3 : vector<1x128xf32> to vector<8x128xf32>
    %5 = arith.addf %2, %4 : vector<8x128xf32>
    %6 = math.sin %5 : vector<8x128xf32>
    %c0_5 = arith.constant 0 : index
    %c0_6 = arith.constant 0 : index
    %7 = vector.load %arg3[%c0_5, %c0_6] : memref<8x128xf32, #tpu.memory_space<vmem>>, vector<8x128xf32>
    %8 = arith.addf %7, %6 : vector<8x128xf32>
    %c0_7 = arith.constant 0 : index
    %c0_8 = arith.constant 0 : index
    %9 = vector.load %arg5[%c0_7, %c0_8] : memref<8x128xf32, #tpu.memory_space<vmem>>, vector<8x128xf32>
    tpu.vector_store %arg5[%c0_7, %c0_8], %8 {strides = array<i32>} : memref<8x128xf32, #tpu.memory_space<vmem>>, vector<8x128xf32>,
    return
  }
  func.func @transform_0(%arg0: i32) -> (i32, i32) {
    %c0_i32 = arith.constant 0 : i32
    %c0_i32_0 = arith.constant 0 : i32
    %c0_i32_1 = arith.constant 0 : i32
    return %c0_i32, %c0_i32_0 : i32, i32
  }
  func.func @transform_1(%arg0: i32) -> (i32, i32) {
    %c0_i32 = arith.constant 0 : i32
    %c0_i32_0 = arith.constant 0 : i32
    %c0_i32_1 = arith.constant 0 : i32
    return %c0_i32, %c0_i32_0 : i32, i32
  }
  func.func @transform_2(%arg0: i32) -> (i32, i32) {
    %c0_i32 = arith.constant 0 : i32
    %c0_i32_0 = arith.constant 0 : i32
    return %arg0, %c0_i32 : i32, i32
  }
  func.func @transform_3(%arg0: i32) -> (i32, i32) {
    %c0_i32 = arith.constant 0 : i32
    %c0_i32_0 = arith.constant 0 : i32
    return %arg0, %c0_i32 : i32, i32
  }
  func.func @transform_4(%arg0: i32) -> (i32, i32) {
    %c0_i32 = arith.constant 0 : i32
    %c0_i32_0 = arith.constant 0 : i32
    return %arg0, %c0_i32 : i32, i32
  }
}

</mosaic_0001>

<bundles_post_ra>
// kernel: tpu_custom_call.1
= control target key start
LH: loop header
LB: loop body
LE: loop exit
PB: predicated region body
PF: predicated region fallthrough
CT: control target
= control target key end

     0   :  { %9 = vsyncpa [#allocation3], 0  ;;  %s658_s0 = inlined_call_operand.hbm [shape: f32[8,128], index: 0, kind: input, shape index: {}]   ;;  %s659_s1 = inlined_call_operand.hbm [shape: f32[1,128], index: 1, kind: input, shape index: {}]   ;;  %s660_s2 = inlined_call_operand.hbm [shape: f32[8,128], index: 2, kind: input, shape index: {}]   ;;  %s661_s3 = inlined_call_operand.hbm [shape: f32[8,8], index: 3, kind: input, shape index: {}]   ;;  %s662_s4 = inlined_call_operand.hbm [shape: f32[8,128], index: 4, kind: output, shape index: {}]  }
   0x1   :  { %10 = vsyncpa [#allocation6], 0 }
   0x2   :  { %11 = vsyncpa [#allocation9], 0  ;;  %s29_s17 = sshll.u32 %s659_s1, 4  ;;  %s30_s17 = int_to_ptr.hbm [resolvable:$true] %s29_s17 }
   0x3   :  { %12 = vsyncpa [#allocation4], 0  ;;  %s550_s18 = smov [#allocation5]   ;;  %s18_s22 = sshll.u32 %s658_s0, 4  ;;  %s19_s22 = int_to_ptr.hbm [resolvable:$true] %s18_s22 }
   0x4   :  { %s31_s19 = sshll.u32 %s550_s18, 4  ;;  %s551_s23 = smov [#allocation2]   ;;  %s32_s19 = int_to_ptr.vmem [resolvable:$true] %s31_s19 }
   0x5   :  { %34 = dma.hbm_to_vmem [thread:$0]  %s30_s17, 16, %s32_s19, [#allocation6]  }
   0x6   :  { %s20_s24 = sshll.u32 %s551_s23, 4  ;;  %s40_s27 = sshll.u32 %s660_s2, 4  ;;  %s21_s24 = int_to_ptr.vmem [resolvable:$true] %s20_s24  ;;  %s41_s27 = int_to_ptr.hbm [resolvable:$true] %s40_s27 }
   0x7   :  { %23 = dma.hbm_to_vmem [thread:$0]  %s19_s22, 128, %s21_s24, [#allocation3]  }
   0x8   :  { %s51_s29 = sshll.u32 %s661_s3, 4  ;;  %s552_s30 = smov [#allocation7]   ;;  %s52_s29 = int_to_ptr.hbm [resolvable:$true] %s51_s29 }
   0x9   :  { %s42_s5 = sshll.u32 %s552_s30, 4  ;;  %s553_s0 = smov [#allocation8]   ;;  %s43_s5 = int_to_ptr.vmem [resolvable:$true] %s42_s5 }
   0xa   :  { %45 = dma.hbm_to_vmem [thread:$0]  %s41_s27, 128, %s43_s5, [#allocation6]  }
   0xb   :  { %s53_s6 = sshll.u32 %s553_s0, 4  ;;  %s54_s6 = int_to_ptr.vmem [resolvable:$true] %s53_s6 }
   0xc   :  { %56 = dma.hbm_to_vmem [thread:$0]  %s52_s29, 128, %s54_s6, [#allocation9]  }
   0xd   :  { %542 = dma.done.wait [#allocation3], 128  }
   0xe   :  { %543 = vsyncadd [#allocation3], 4294967168 }
   0xf   :  { %544 = dma.done.wait [#allocation6], 144  }
  0x10   :  { %545 = vsyncadd [#allocation6], 4294967152 }
  0x11   :  { %546 = dma.done.wait [#allocation9], 128  }
  0x12   :  { %547 = vsyncadd [#allocation9], 4294967168  ;;  %vm79_vm0 = vcmask 64512   ;;  %v74_v0 = vld [vmem:[#allocation2] sm:$0xff]  ;;  %v73_v1 = vld [vmem:[#allocation8] sm:$0xff]  ;;  %s561_s2 = smov [#allocation10]  }
  0x13   :  { %v98_v2 = vand.u32 4294901760, %v74_v0  ;;  %v81_v3 = vsel %vm79_vm0, %v73_v1, 0  ;;  %v421_v13 = vld [vmem:[#allocation5] ss:$0 sm:$0xff]  ;;  %v554_v37 = vmov 683565275  }
  0x14   :  { %v100_v4 = vand.u32 4294901760, %v81_v3  ;;  %v555_v39 = vmov 2475754826   ;;  %v556_v42 = vmov 2131351028   ;;  %s392_s3 = sshll.u32 %s561_s2, 4  ;;  %s393_s3 = int_to_ptr.vmem [resolvable:$true] %s392_s3 }
  0x15   :  { %v125_v5 = vsub.f32 %v74_v0, %v98_v2  ;;  %99 = vmatpush.msra.mxu0 %v98_v2  ;;  %175 = vmatpush.msra.mxu3 %v98_v2  ;;  %v557_v45 = vmov 2102212464   ;;  %v558_v48 = vmov 920167782   ;;  %v559_v51 = vmov 1326507024  }
  0x16   :  { %v101_v6 = vsub.f32 %v81_v3, %v100_v4  ;;  %s394_s9 = sshll.u32 %s662_s4, 4  ;;  %s395_s9 = int_to_ptr.hbm [resolvable:$true] %s394_s9 }
  0x17   :  { %152 = vmatpush.msra.mxu2 %v125_v5  ;;  %v126_v7 = vand.u32 4294901760, %v125_v5 }
  0x18   :  { %155 = vmatmul.f32.vlgmr.msra.gmra.mxu2 %v101_v6  ;;  %v102_v8 = vand.u32 4294901760, %v101_v6 }
  0x19   :  { %201 = vmatpush.msrb.mxu0 %v126_v7  ;;  %v127_v9 = vsub.f32 %v125_v5, %v126_v7 }
  0x1a   :  { %v103_v10 = vsub.f32 %v101_v6, %v102_v8  ;;  %179 = vmatmul.f32.vlgmr.msra.gmra.mxu3 %v102_v8 }
  0x1b   :  { %v128_v11 = vand.u32 4294901760, %v127_v9 }
  0x1c   :  { %v104_v12 = vand.u32 4294901760, %v103_v10 }
  0x1d   :  { %129 = vmatpush.msra.mxu1 %v128_v11 }
  0x1e   :  { %105 = vmatmul.f32.vlgmr.msra.gmra.mxu0 %v104_v12  ;;  %131 = vmatmul.f32.vlgmr.msra.gmra.mxu1 %v100_v4 }
  0x1f   :  { %223 = vmatpush.msrb.mxu1 %v98_v2 }
  0x26   :  { %203 = vmatmul.f32.vlgmr.msrb.gmra.mxu0 %v100_v4  ;;  %225 = vmatmul.f32.vlgmr.msrb.gmra.mxu1 %v100_v4 }
  0x9b   :  { %v106_v14 = vpop.f32.mrf.mxu0  ;;  %v132_v15 = vpop.f32.mrf.mxu1 }
  0x9c   :  { %v107_v16 = vadd.f32 %v421_v13, %v106_v14  ;;  %v156_v17 = vpop.f32.mrf.mxu2 }
  0x9d   :  { %v180_v19 = vpop.f32.mrf.mxu3 }
  0x9e   :  { %v133_v18 = vadd.f32 %v132_v15, %v107_v16 }
  0xa0   :  { %v157_v20 = vadd.f32 %v156_v17, %v133_v18 }
  0xa2   :  { %v181_v21 = vadd.f32 %v180_v19, %v157_v20 }
  0xa3   :  { %v204_v22 = vpop.f32.mrf.mxu0  ;;  %v226_v23 = vpop.f32.mrf.mxu1 }
  0xa4   :  { %v205_v24 = vadd.f32 %v204_v22, %v181_v21  ;;  %v560_v21 = vmov 0  }
  0xa6   :  { %v599_v25 = vadd.f32 %v226_v23, %v205_v24 }
  0xa8   :  { %v232_v26 = vand.u32 2139095040, %v599_v25  ;;  %v229_v29 = vand.u32 2147483647, %v599_v25  ;;  %vm231_vm13 = vcmp.lt.s32.totalorder %v599_v25, 0 }
  0xaa   :  { %v233_v27 = vshrl.u32 %v232_v26, 23  ;;  %v236_v31 = vand.u32 8388607, %v229_v29  ;;  %vm230_vm14 = vcmp.le.f32.partialorder %v229_v29, 0.7853982 }
  0xac   :  { %v406_v28 = vadd.s32 4294967169, %v233_v27  ;;  %v237_v35 = vor.u32 8388608, %v236_v31 }
  0xae   :  { %v239_v30 = vadd.s32 1, %v406_v28  ;;  %v616_v58 = vshll.u32 %v237_v35, 8 }
  0xb0   :  { %vm240_vm1 = vcmp.gt.s32.totalorder %v239_v30, 0  ;;  %v278_v3 = vand.u32 65535, %v616_v58  ;;  %v279_v4 = vshrl.u32 %v616_v58, 16 }
  0xb1   :  { %v241_v32 = vsel %vm240_vm1, %v239_v30, 0 }
  0xb2   :  { %v243_v33 = vand.u32 31, %v241_v32  ;;  %v607_v36 = vshrl.u32 %v241_v32, 5 }
  0xb4   :  { %v605_v34 = vsub.s32 32, %v243_v33  ;;  %v246_v38 = vshll.u32 %v554_v37, %v243_v33  ;;  %v249_v40 = vshll.u32 %v555_v39, %v243_v33  ;;  %v252_v44 = vshll.u32 %v556_v42, %v243_v33 }
  0xb5   :  { %v255_v47 = vshll.u32 %v557_v45, %v243_v33  ;;  %v258_v50 = vshll.u32 %v558_v48, %v243_v33  ;;  %vm261_vm2 = vcmp.lt.s32.totalorder %v607_v36, 1  ;;  %vm264_vm3 = vcmp.lt.s32.totalorder %v607_v36, 4 }
  0xb6   :  { %v247_v41 = vshrl.u32 %v555_v39, %v605_v34  ;;  %v250_v43 = vshrl.u32 %v556_v42, %v605_v34  ;;  %v253_v46 = vshrl.u32 %v557_v45, %v605_v34  ;;  %v256_v49 = vshrl.u32 %v558_v48, %v605_v34 }
  0xb7   :  { %v259_v52 = vshrl.u32 %v559_v51, %v605_v34  ;;  %vm263_vm4 = vcmp.lt.s32.totalorder %v607_v36, 3  ;;  %vm262_vm5 = vcmp.lt.s32.totalorder %v607_v36, 2  ;;  %v245_v32 = vshrl.u32 %v554_v37, %v605_v34 }
  0xb8   :  { %v248_v53 = vor.u32 %v247_v41, %v246_v38  ;;  %v251_v54 = vor.u32 %v250_v43, %v249_v40  ;;  %v254_v55 = vor.u32 %v253_v46, %v252_v44  ;;  %v257_v56 = vor.u32 %v256_v49, %v255_v47 }
  0xb9   :  { %v260_v57 = vor.u32 %v259_v52, %v258_v50 }
  0xba   :  { %v269_v59 = vsel %vm261_vm2, %v248_v53, %v251_v54  ;;  %v273_v60 = vsel %vm261_vm2, %v251_v54, %v254_v55  ;;  %v270_v61 = vsel %vm264_vm3, %v257_v56, 920167782  ;;  %v266_v28 = vsel %vm264_vm3, %v254_v55, 2102212464 }
  0xbb   :  { %v274_v62 = vsel %vm264_vm3, %v260_v57, 1326507024  ;;  %v271_v63 = vsel %vm263_vm4, %v254_v55, %v270_v61  ;;  %v265_v41 = vsel %vm261_vm2, %v245_v32, %v248_v53  ;;  %v267_v42 = vsel %vm263_vm4, %v251_v54, %v266_v28 }
  0xbc   :  { %v275_v0 = vsel %vm263_vm4, %v257_v56, %v274_v62  ;;  %v272_v1 = vsel %vm262_vm5, %v269_v59, %v271_v63  ;;  %v268_v34 = vsel %vm262_vm5, %v265_v41, %v267_v42  ;;  %vm372_vm2 = vweird.f32 %v599_v25 }
  0xbd   :  { %v276_v2 = vsel %vm262_vm5, %v273_v60, %v275_v0  ;;  %v302_v7 = vand.u32 65535, %v272_v1  ;;  %v303_v8 = vshrl.u32 %v272_v1, 16  ;;  %v322_v50 = vmul.u32 %v616_v58, %v268_v34 }
  0xbe   :  { %v280_v5 = vand.u32 65535, %v276_v2  ;;  %v281_v6 = vshrl.u32 %v276_v2, 16 }
  0xbf   :  { %v305_v11 = vmul.u32 %v303_v8, %v278_v3  ;;  %v306_v12 = vmul.u32 %v302_v7, %v279_v4  ;;  %v304_v16 = vmul.u32 %v302_v7, %v278_v3  ;;  %v307_v20 = vmul.u32 %v303_v8, %v279_v4 }
  0xc0   :  { %v283_v9 = vmul.u32 %v281_v6, %v278_v3  ;;  %v284_v10 = vmul.u32 %v280_v5, %v279_v4  ;;  %v282_v13 = vmul.u32 %v280_v5, %v278_v3  ;;  %v285_v15 = vmul.u32 %v281_v6, %v279_v4 }
  0xc1   :  { %v308_v17 = vshll.u32 %v305_v11, 16  ;;  %v310_v23 = vshll.u32 %v306_v12, 16  ;;  %v309_v39 = vshrl.u32 %v305_v11, 16  ;;  %v311_v45 = vshrl.u32 %v306_v12, 16 }
  0xc2   :  { %v286_v14 = vshll.u32 %v283_v9, 16  ;;  %v288_v18 = vshll.u32 %v284_v10, 16  ;;  %v287_v33 = vshrl.u32 %v283_v9, 16  ;;  %v289_v43 = vshrl.u32 %v284_v10, 16 }
  0xc3   :  { %vm312_vm7 = vc.u32 %v304_v16, %v308_v17  ;;  %v314_v24 = vadd.s32 %v308_v17, %v304_v16 }
  0xc4   :  { %vm290_vm6 = vc.u32 %v282_v13, %v286_v14  ;;  %v292_v19 = vadd.s32 %v286_v14, %v282_v13  ;;  %v313_v27 = vsel %vm312_vm7, 1, %v560_v21 }
  0xc5   :  { %v291_v22 = vsel %vm290_vm6, 1, %v560_v21  ;;  %v315_v31 = vadd.s32 %v313_v27, %v307_v20  ;;  %vm316_vm9 = vc.u32 %v314_v24, %v310_v23  ;;  %v318_v48 = vadd.s32 %v314_v24, %v310_v23 }
  0xc6   :  { %v293_v26 = vadd.s32 %v291_v22, %v285_v15  ;;  %vm294_vm8 = vc.u32 %v292_v19, %v288_v18  ;;  %v317_v38 = vsel %vm316_vm9, 1, %v560_v21 }
  0xc7   :  { %v295_v30 = vsel %vm294_vm8, 1, %v560_v21  ;;  %v319_v40 = vadd.s32 %v317_v38, %v315_v31 }
  0xc8   :  { %v297_v35 = vadd.s32 %v295_v30, %v293_v26 }
  0xc9   :  { %v320_v46 = vadd.s32 %v319_v40, %v309_v39  ;;  %v384_v39 = vld [vmem:[#allocation7] sm:$0xff] }
  0xca   :  { %v298_v44 = vadd.s32 %v297_v35, %v287_v33 }
  0xcb   :  { %v321_v37 = vadd.s32 %v320_v46, %v311_v45 }
  0xcc   :  { %v299_v47 = vadd.s32 %v298_v44, %v289_v43 }
  0xcd   :  { %v325_v49 = vadd.s32 1, %v321_v37 }
  0xce   :  { %vm324_vm10 = vc.u32 %v299_v47, %v318_v48  ;;  %v323_v36 = vadd.s32 %v318_v48, %v299_v47 }
  0xcf   :  { %v326_v51 = vsel %vm324_vm10, %v325_v49, %v321_v37 }
  0xd0   :  { %v327_v52 = vadd.s32 %v326_v51, %v322_v50 }
  0xd2   :  { %v328_v53 = vadd.s32 536870912, %v327_v52 }
  0xd4   :  { %v329_v55 = vshrl.u32 %v328_v53, 30 }
  0xd6   :  { %v330_v56 = vshll.u32 %v329_v55, 30  ;;  %v353_v11 = vsub.s32 4, %v329_v55 }
  0xd8   :  { %v331_v54 = vsub.s32 %v327_v52, %v330_v56  ;;  %v354_v16 = vsel %vm231_vm13, %v353_v11, %v329_v55 }
  0xd9   :  { %v356_v20 = vsel %vm230_vm14, 0, %v354_v16 }
  0xda   :  { %vm332_vm11 = vcmp.lt.s32.totalorder %v331_v54, 0  ;;  %v333_v57 = vsub.s32 0, %v331_v54  ;;  %v373_v24 = vadd.s32 3, %v356_v20 }
  0xdc   :  { %v334_v59 = vsel %vm332_vm11, %v333_v57, %v331_v54  ;;  %v374_v30 = vand.u32 3, %v373_v24 }
  0xdd   :  { %v335_v60 = vclz %v334_v59 }
  0xde   :  { %vm376_vm15 = vcmp.eq.s32.totalorder %v374_v30, 0  ;;  %vm379_vm0 = vcmp.eq.s32.totalorder %v374_v30, 2  ;;  %vm375_vm1 = vcmp.lt.s32.totalorder %v374_v30, 2 }
  0xdf   :  { %v407_v61 = vadd.s32 4294967294, %v335_v60 }
  0xe1   :  { %vm408_vm12 = vcmp.lt.s32.totalorder %v407_v61, 0 }
  0xe2   :  { %v338_v62 = vsel %vm408_vm12, 0, %v407_v61 }
  0xe3   :  { %v339_v63 = vsub.s32 32, %v338_v62  ;;  %v343_v0 = vsub.s32 4294967266, %v338_v62  ;;  %v340_v1 = vshll.u32 %v331_v54, %v338_v62 }
  0xe5   :  { %v341_v2 = vshrl.u32 %v323_v36, %v339_v63  ;;  %v344_v3 = vadd.s32 127, %v343_v0 }
  0xe7   :  { %v342_v58 = vor.u32 %v341_v2, %v340_v1  ;;  %v345_v4 = vshll.u32 %v344_v3, 23 }
  0xe9   :  { %v346_v5 = vor.u32 4788187, %v345_v4  ;;  %v349_v7 = vcvt.s32.f32 %v342_v58 }
  0xeb   :  { %v347_v6 = vand.u32 2147483647, %v346_v5 }
  0xed   :  { %v350_v8 = vmul.f32 %v349_v7, %v347_v6 }
  0xef   :  { %v351_v9 = vxor.u32 2147483648, %v350_v8 }
  0xf1   :  { %v352_v10 = vsel %vm231_vm13, %v351_v9, %v350_v8 }
  0xf2   :  { %v355_v12 = vsel %vm230_vm14, %v599_v25, %v352_v10 }
  0xf3   :  { %v357_v13 = vmul.f32 %v355_v12, %v355_v12 }
  0xf5   :  { %v365_v14 = vmul.f32 -0.00019511016, %v357_v13  ;;  %v358_v15 = vmul.f32 -0.001358992, %v357_v13 }
  0xf7   :  { %v366_v17 = vadd.f32 0.008332121, %v365_v14  ;;  %v359_v18 = vadd.f32 0.041655596, %v358_v15 }
  0xf9   :  { %v367_v19 = vmul.f32 %v366_v17, %v357_v13  ;;  %v360_v21 = vmul.f32 %v359_v18, %v357_v13 }
  0xfb   :  { %v368_v22 = vadd.f32 -0.16666654, %v367_v19  ;;  %v361_v23 = vadd.f32 -0.4999988, %v360_v21 }
  0xfd   :  { %v369_v26 = vmul.f32 %v368_v22, %v357_v13  ;;  %v362_v27 = vmul.f32 %v361_v23, %v357_v13 }
  0xff   :  { %v370_v28 = vadd.f32 1.0, %v369_v26  ;;  %v363_v29 = vadd.f32 1.0, %v362_v27 }
 0x101   :  { %v371_v31 = vmul.f32 %v370_v28, %v355_v12  ;;  %v380_v32 = vxor.u32 2147483648, %v363_v29 }
 0x103   :  { %v377_v33 = vxor.u32 2147483648, %v371_v31  ;;  %v381_v38 = vsel %vm379_vm0, %v380_v32, %v371_v31 }
 0x105   :  { %v378_v35 = vsel %vm376_vm15, %v363_v29, %v377_v33 }
 0x106   :  { %v382_v40 = vsel %vm375_vm1, %v378_v35, %v381_v38 }
 0x107   :  { %v383_v41 = vsel %vm372_vm2, nan, %v382_v40 }
 0x108   :  { %v385_v42 = vadd.f32 %v384_v39, %v383_v41 }
 0x10a   :  { %386 = vst [vmem:[#allocation10] sm:$0xff] %v385_v42 }
 0x10b   :  { %397 = dma.vmem_to_hbm [thread:$0]  %s393_s3, 128, %s395_s9, [#allocation4]  }
 0x10c   :  { %548 = dma.done.wait [#allocation4], 128  }
 0x10d   :  { %549 = vsyncadd [#allocation4], 4294967168 }
 0x10e   :  { %402 = vsyncpa [#allocation3], 1 }
 0x10f   :  { %403 = vsyncpa [#allocation6], 1 }
 0x110   :  { %404 = vsyncpa [#allocation9], 1 }
 0x111   :  { %405 = vsyncpa [#allocation4], 1 }

</bundles_post_ra>
